<compile_context>
chip_gen: v6e
topology: v6e:2x2x1
jax: 0.10.0
libtpu: 0.0.40
codegen_flags: <defaults>
</compile_context>

<pallas_src>
import math

import jax
import jax.numpy as jnp
import numpy as np
from jax.experimental import pallas as pl
from jax.experimental.pallas import tpu as pltpu

_LANE = 128
_MAX_TILE_ROWS = 1024  # 1024 x 128 f32 = 512 KiB per input block


def _round_up(x, m):
    return -(-x // m) * m


# ----------------------------- kernel ---------------------------------------


def _sq_sum_kernel(p_ref, t_ref, o_ref, acc_ref):
    """Accumulate sum((p - t)^2) for one image across row chunks."""
    r = pl.program_id(1)

    @pl.when(r == 0)
    def _():
        acc_ref[...] = jnp.zeros_like(acc_ref)

    d = p_ref[...].astype(jnp.float32) - t_ref[...].astype(jnp.float32)
    # Pure VPU work per step; no cross-lane reduction on the critical path.
    acc_ref[...] = acc_ref[...] + d * d

    @pl.when(r == pl.num_programs(1) - 1)
    def _():
        s = jnp.sum(acc_ref[...])  # single XLU reduce per image
        o_ref[...] = jnp.full(o_ref.shape, s, dtype=jnp.float32)


# ----------------------------- wrapper ---------------------------------------


def _per_image_sq_sum(pred, target):
    """Returns (N,) float32 array of per-image sum((pred - target)^2)."""
    n = pred.shape[0]
    m = int(np.prod(pred.shape[1:]))

    rows_raw = -(-m // _LANE)
    tile_rows = min(_MAX_TILE_ROWS, _round_up(rows_raw, 8))
    rows = _round_up(rows_raw, tile_rows)
    pad = rows * _LANE - m

    p = pred.reshape(n, m)
    t = target.reshape(n, m)
    if pad:
        # Only the ragged tail is padded; padded zeros contribute (0-0)^2 = 0.
        p = jnp.pad(p, ((0, 0), (0, pad)))
        t = jnp.pad(t, ((0, 0), (0, pad)))
    p = p.reshape(n, rows, _LANE)
    t = t.reshape(n, rows, _LANE)

    grid = (n, rows // tile_rows)
    in_spec = pl.BlockSpec((None, tile_rows, _LANE), lambda i, r: (i, r, 0))
    out_spec = pl.BlockSpec((None, 8, _LANE), lambda i, r: (i, 0, 0))

    out = pl.pallas_call(
        _sq_sum_kernel,
        out_shape=jax.ShapeDtypeStruct((n, 8, _LANE), jnp.float32),
        grid_spec=pltpu.PrefetchScalarGridSpec(
            num_scalar_prefetch=0,
            grid=grid,
            in_specs=[in_spec, in_spec],
            out_specs=out_spec,
            scratch_shapes=[pltpu.VMEM((tile_rows, _LANE), jnp.float32)],
        ),
        compiler_params=pltpu.CompilerParams(
            dimension_semantics=("parallel", "arbitrary")),
    )(p, t)
    return out[:, 0, 0]


class PSNRLoss:
    """PSNR loss, mirroring basicsr's PSNRLoss forward semantics."""

    def __init__(self, loss_weight=1.0, reduction='mean', toY=False):
        assert reduction == 'mean'
        self.loss_weight = loss_weight
        self.scale = 10.0 / math.log(10.0)
        self.toY = toY
        self.coef = jnp.asarray(
            [65.481, 128.553, 24.966], dtype=jnp.float32).reshape(1, 3, 1, 1)

    def __call__(self, pred, target):
        assert pred.ndim == 4
        if self.toY:
            # TODO(synk): toY RGB->Y conversion runs in plain JAX; it is not
            # fused into the Pallas kernel.
            coef = self.coef.astype(pred.dtype)
            pred = (pred * coef).sum(axis=1, keepdims=True) + 16.0
            target = (target * coef).sum(axis=1, keepdims=True) + 16.0
            pred = pred / 255.0
            target = target / 255.0
        assert pred.ndim == 4

        m = int(np.prod(pred.shape[1:]))
        sq_sums = _per_image_sq_sum(pred, target)            # (N,) f32
        mse = sq_sums / jnp.float32(m)                       # per-image mean
        return self.loss_weight * self.scale * jnp.mean(jnp.log(mse + 1e-8))


if __name__ == "__main__":
    key = jax.random.PRNGKey(0)
    k1, k2 = jax.random.split(key)
    pred = jax.random.uniform(k1, (2, 3, 16, 16), dtype=jnp.float32)
    target = jax.random.uniform(k2, (2, 3, 16, 16), dtype=jnp.float32)

    scale = 10.0 / math.log(10.0)

    # default path (toY=False)
    loss = jax.block_until_ready(PSNRLoss(loss_weight=1.0)(pred, target))
    ref = scale * jnp.mean(
        jnp.log(jnp.mean((pred - target) ** 2, axis=(1, 2, 3)) + 1e-8))
    assert jnp.allclose(loss, ref, rtol=1e-5, atol=1e-6), (loss, ref)

    # toY path
    loss_y = jax.block_until_ready(PSNRLoss(toY=True)(pred, target))
    coef = jnp.asarray([65.481, 128.553, 24.966]).reshape(1, 3, 1, 1)
    py = ((pred * coef).sum(axis=1, keepdims=True) + 16.0) / 255.0
    ty = ((target * coef).sum(axis=1, keepdims=True) + 16.0) / 255.0
    ref_y = scale * jnp.mean(
        jnp.log(jnp.mean((py - ty) ** 2, axis=(1, 2, 3)) + 1e-8))
    assert jnp.allclose(loss_y, ref_y, rtol=1e-5, atol=1e-6), (loss_y, ref_y)

    # loss_weight scaling
    loss_w = jax.block_until_ready(PSNRLoss(loss_weight=0.5)(pred, target))
    assert jnp.allclose(loss_w, 0.5 * ref, rtol=1e-5, atol=1e-6)

    print("KERNEL_OK")
</pallas_src>

<mosaic_0001>
module attributes {stable_mosaic.version = 11 : i64} {
  func.func @_sq_sum_kernel(%arg0: i32, %arg1: i32, %arg2: memref<1x8x128xf32, #tpu.memory_space<vmem>>, %arg3: memref<1x8x128xf32, #tpu.memory_space<vmem>>, %arg4: memref<1x8x128xf32, #tpu.memory_space<vmem>>, %arg5: memref<8x128xf32, #tpu.memory_space<vmem>>) attributes {dimension_semantics = [#tpu.dimension_semantics<parallel>, #tpu.dimension_semantics<arbitrary>], iteration_bounds = array<i64: 2, 1>, scalar_prefetch = 0 : i64, scratch_operands = 1 : i64, tpu.core_type = #tpu.core_type<tc>, window_params = [{transform_indices = @transform_0, window_bounds = array<i64: 1, 8, 128>}, {transform_indices = @transform_1, window_bounds = array<i64: 1, 8, 128>}, {transform_indices = @transform_2, window_bounds = array<i64: 1, 8, 128>}]} {
    %c0_i32 = arith.constant 0 : i32
    %0 = arith.cmpi eq, %arg1, %c0_i32 : i32
    %1 = arith.extui %0 : i1 to i32
    %c0_i32_0 = arith.constant 0 : i32
    %2 = arith.cmpi ne, %1, %c0_i32_0 : i32
    scf.if %2 {
      %cst = arith.constant 0.000000e+00 : f32
      %15 = vector.broadcast %cst : f32 to vector<8x128xf32>
      %c0_12 = arith.constant 0 : index
      %c0_13 = arith.constant 0 : index
      %16 = vector.load %arg5[%c0_12, %c0_13] : memref<8x128xf32, #tpu.memory_space<vmem>>, vector<8x128xf32>
      tpu.vector_store %arg5[%c0_12, %c0_13], %15 {strides = array<i32>} : memref<8x128xf32, #tpu.memory_space<vmem>>, vector<8x128xf32>,
    } else {
    }
    %c0 = arith.constant 0 : index
    %c0_1 = arith.constant 0 : index
    %c0_2 = arith.constant 0 : index
    %3 = vector.load %arg2[%c0, %c0_1, %c0_2] : memref<1x8x128xf32, #tpu.memory_space<vmem>>, vector<1x8x128xf32>
    %4 = vector.shape_cast %3 : vector<1x8x128xf32> to vector<8x128xf32>
    %c0_3 = arith.constant 0 : index
    %c0_4 = arith.constant 0 : index
    %c0_5 = arith.constant 0 : index
    %5 = vector.load %arg3[%c0_3, %c0_4, %c0_5] : memref<1x8x128xf32, #tpu.memory_space<vmem>>, vector<1x8x128xf32>
    %6 = vector.shape_cast %5 : vector<1x8x128xf32> to vector<8x128xf32>
    %7 = arith.subf %4, %6 : vector<8x128xf32>
    %c0_6 = arith.constant 0 : index
    %c0_7 = arith.constant 0 : index
    %8 = vector.load %arg5[%c0_6, %c0_7] : memref<8x128xf32, #tpu.memory_space<vmem>>, vector<8x128xf32>
    %9 = arith.mulf %7, %7 : vector<8x128xf32>
    %10 = arith.addf %8, %9 : vector<8x128xf32>
    %c0_8 = arith.constant 0 : index
    %c0_9 = arith.constant 0 : index
    %11 = vector.load %arg5[%c0_8, %c0_9] : memref<8x128xf32, #tpu.memory_space<vmem>>, vector<8x128xf32>
    tpu.vector_store %arg5[%c0_8, %c0_9], %10 {strides = array<i32>} : memref<8x128xf32, #tpu.memory_space<vmem>>, vector<8x128xf32>,
    %c0_i32_10 = arith.constant 0 : i32
    %12 = arith.cmpi eq, %arg1, %c0_i32_10 : i32
    %13 = arith.extui %12 : i1 to i32
    %c0_i32_11 = arith.constant 0 : i32
    %14 = arith.cmpi ne, %13, %c0_i32_11 : i32
    scf.if %14 {
      %c0_12 = arith.constant 0 : index
      %c0_13 = arith.constant 0 : index
      %15 = vector.load %arg5[%c0_12, %c0_13] : memref<8x128xf32, #tpu.memory_space<vmem>>, vector<8x128xf32>
      %16 = vector.shape_cast %15 : vector<8x128xf32> to vector<1x8x128xf32>
      %cst = arith.constant dense<0.000000e+00> : vector<1xf32>
      %17 = vector.multi_reduction <add>, %16, %cst [1, 2] : vector<1x8x128xf32> to vector<1xf32>
      %18 = vector.shape_cast %17 : vector<1xf32> to vector<1x1x1xf32>
      %19 = vector.extract %18[0, 0, 0] : f32 from vector<1x1x1xf32>
      %20 = vector.broadcast %19 : f32 to vector<8x128xf32>
      %c0_14 = arith.constant 0 : index
      %c0_15 = arith.constant 0 : index
      %c0_16 = arith.constant 0 : index
      %21 = vector.load %arg4[%c0_14, %c0_15, %c0_16] : memref<1x8x128xf32, #tpu.memory_space<vmem>>, vector<1x8x128xf32>
      %22 = vector.shape_cast %21 : vector<1x8x128xf32> to vector<8x128xf32>
      %23 = vector.shape_cast %20 : vector<8x128xf32> to vector<1x8x128xf32>
      tpu.vector_store %arg4[%c0_14, %c0_15, %c0_16], %23 {strides = array<i32>} : memref<1x8x128xf32, #tpu.memory_space<vmem>>, vector<1x8x128xf32>,
    } else {
    }
    return
  }
  func.func @transform_0(%arg0: i32, %arg1: i32) -> (i32, i32, i32) {
    %c0_i32 = arith.constant 0 : i32
    %c0_i32_0 = arith.constant 0 : i32
    return %arg0, %arg1, %c0_i32 : i32, i32, i32
  }
  func.func @transform_1(%arg0: i32, %arg1: i32) -> (i32, i32, i32) {
    %c0_i32 = arith.constant 0 : i32
    %c0_i32_0 = arith.constant 0 : i32
    return %arg0, %arg1, %c0_i32 : i32, i32, i32
  }
  func.func @transform_2(%arg0: i32, %arg1: i32) -> (i32, i32, i32) {
    %c0_i32 = arith.constant 0 : i32
    %c0_i32_0 = arith.constant 0 : i32
    %c0_i32_1 = arith.constant 0 : i32
    return %arg0, %c0_i32, %c0_i32_0 : i32, i32, i32
  }
}

</mosaic_0001>

<bundles_post_ra>
// kernel: tpu_custom_call.1
= control target key start
LH: loop header
LB: loop body
LE: loop exit
PB: predicated region body
PF: predicated region fallthrough
CT: control target
= control target key end

     0   :  { %7 = vsyncpa [#allocation4], 0  ;;  %s775_s0 = inlined_call_operand.hbm [shape: f32[2,8,128], index: 0, kind: input, shape index: {}]   ;;  %s776_s1 = inlined_call_operand.hbm [shape: f32[2,8,128], index: 1, kind: input, shape index: {}]   ;;  %s777_s2 = inlined_call_operand.hbm [shape: f32[2,8,128], index: 2, kind: output, shape index: {}]  }
   0x1   :  { %9 = vsyncpa [#allocation4 + $0x1], 0 }
   0x2   :  { %10 = vsyncpa [#allocation7], 0 }
   0x3   :  { %12 = vsyncpa [#allocation7 + $0x1], 0 }
   0x4   :  { %13 = vsyncpa [#allocation5], 0 }
   0x5   :  { %15 = vsyncpa [#allocation5 + $0x1], 0  ;;  %s603_s9 = smov 0   ;;  %s605_s10 = smov 0  }
   0x6   :  { %s607_s11 = smov 0   ;;  %s609_s12 = smov 0  }
   0x7   :  { %s611_s13 = smov 0   ;;  %s613_s14 = smov 0  }
   0x8 LB: > { %s358_s15 = sadd.s32 4294967295, %s583_s14   ;;  %s359_s16 = sadd.s32 4294967294, %s583_s14   ;;  %s583_s14 = sphi %s613_s14, %s21_s14   ;;  %s579_s13 = sphi %s611_s13, %s789_s13   ;;  %s575_s12 = sphi %s609_s12, %s788_s12   ;;  %s571_s11 = sphi %s607_s11, %s787_s11   ;;  %s567_s10 = sphi %s605_s10, %s786_s10   ;;  %s563_s9 = sphi %s603_s9, %s785_s9  }
   0x9   : > { %s33_s17 = sadd.s32 1, %s579_s13  ;;  %s42_s18 = sadd.s32 1, %s571_s11 }
   0xa   : > { %p35_p0 = scmp.ge.s32.totalorder %s33_s17, 2  ;;  %p49_p1 = scmp.ne.s32.totalorder %s571_s11, %s567_s10 }
   0xb   : > { %p50_p2 = scmp.eq.s32.totalorder %s583_s14, 0  ;;  %p55_p3 = scmp.ne.s32.totalorder %s567_s10, %s563_s9 }
   0xc   : > { %s791_s17 = smov (%p35_p0, %s33_s17), 0  ;;  %p56_p5 = scmp.eq.s32.totalorder %s358_s15, 0 }
   0xd   : > { %p644_p4 = por %p50_p2, %p49_p1  ;;  %s37_s20 = ssub.s32 %s579_s13, %s791_s17 }
   0xe   : > { %p107_p6 = scmp.eq.s32.totalorder %s358_s15, 1  ;;  %p40_p7 = scmp.eq.s32.totalorder %s37_s20, 0 }
   0xf   : > { %p650_p8 = por %p56_p5, %p55_p3  ;;  %p113_p10 = scmp.eq.s32.totalorder %s359_s16, 1 }
  0x10   : > { %p654_p9 = por %p107_p6, %p49_p1  ;;  %p393_p13 = scmp.lt.s32.totalorder %s583_s14, 2 }
  0x11   : > { %s659_s23 = scalar_select %p40_p7, %s571_s11, %s42_s18  }
  0x12   : > { %p661_p11 = por %p113_p10, %p55_p3  ;;  %s668_s25 = sand.u32 1, %s571_s11  }
  0x13   : > { %s362_s26 = sshll.u32 %s668_s25, 3  ;;  %s363_s27 = sshll.u32 %s579_s13, 7 }
  0x14   : > { %s143_s30 = scalar_lea.hbm %s775_s0, %s363_s27  ;;  %s137_s3 = scalar_lea.vmem [#allocation3], %s362_s26 }
  0x15   : > { %s145_s4 = sshll.u32 %s137_s3, 4  ;;  %p677_p0 = pnand %p393_p13, %p644_p4  ;;  %s146_s4 = int_to_ptr.vmem [resolvable:$true] %s145_s4 }
  0x16   : > { %p366_p1 = scmp.ge.s32.totalorder %s583_s14, 1  ;;  %p169_p2 = scmp.lt.s32.totalorder %s583_s14, 3 }
  0x17   : > { %s134_s6 = scalar_lea.sflag [#allocation4], %s668_s25  ;;  %p445_p3 = pneg %p677_p0 }
  0x18   : > { %s456_s7 = scalar_lea.vmem %s146_s4, 128  ;;  %s585_s8 = smov [#allocation3]  }
  0x19   : > { %p457_p5 = scmp.ne.s32.totalorder %s146_s4, %s456_s7  ;;  %s461_s15 = sshll.u32 %s585_s8, 4  ;;  %s462_s15 = int_to_ptr.vmem [resolvable:$false] %s461_s15 }
  0x1a   : > { %s463_s16 = scalar_lea.vmem %s462_s15, 256  ;;  %p464_p4 = scmp.lt.s32.totalorder %s146_s4, %s462_s15 }
  0x1b   : > { %p459_p6 = pnand %p457_p5, %p445_p3  ;;  %p465_p10 = scmp.lt.s32.totalorder %s463_s16, %s456_s7 }
  0x1d   : > { %p460_p7 = pneg %p459_p6  ;;  %p466_p13 = por %p465_p10, %p464_p4 }
  0x1f   : > { %p467_p12 = pnand %p466_p13, %p460_p7 }
  0x21   : > { %470 = shalt.err (!%p467_p12)
}
  0x22   : > { %385 = dma.hbm_to_vmem [thread:$0]  (!%p677_p0), %s143_s30, 128, %s146_s4, %s134_s6  }
  0x23   : > { %p695_p5 = pnand %p366_p1, %p169_p2  ;;  %s162_s28 = scalar_lea.hbm %s776_s1, %s363_s27 }
  0x24   : > { %s156_s29 = scalar_lea.vmem [#allocation6], %s362_s26  ;;  %s153_s7 = scalar_lea.sflag [#allocation7], %s668_s25 }
  0x25   : > { %s164_s3 = sshll.u32 %s156_s29, 4  ;;  %s586_s30 = smov [#allocation6]   ;;  %s165_s3 = int_to_ptr.vmem [resolvable:$true] %s164_s3 }
  0x26   : > { %s484_s8 = scalar_lea.vmem %s165_s3, 128  ;;  %s489_s4 = sshll.u32 %s586_s30, 4  ;;  %s490_s4 = int_to_ptr.vmem [resolvable:$false] %s489_s4 }
  0x27   : > { %p485_p12 = scmp.ne.s32.totalorder %s165_s3, %s484_s8  ;;  %s491_s6 = scalar_lea.vmem %s490_s4, 256 }
  0x28   : > { %p492_p1 = scmp.lt.s32.totalorder %s165_s3, %s490_s4  ;;  %p493_p2 = scmp.lt.s32.totalorder %s491_s6, %s484_s8 }
  0x29   : > { %p487_p6 = pnand %p485_p12, %p445_p3 }
  0x2a   : > { %p494_p4 = por %p493_p2, %p492_p1 }
  0x2b   : > { %p488_p7 = pneg %p487_p6 }
  0x2d   : > { %p495_p10 = pnand %p494_p4, %p488_p7 }
  0x2f   : > { %498 = shalt.err (!%p495_p10)
}
  0x30   : > { %388 = dma.hbm_to_vmem [thread:$0]  (!%p677_p0), %s162_s28, 128, %s165_s3, %s153_s7  }
  0x31   : > { %173 = sbr.rel (%p695_p5) target bundleno = 276 (0x114), region = 28  ;;  %s711_s25 = sand.u32 (!%p695_p5), 1, %s567_s10  }
  0x32   : > { %s714_s26 = sshll.u32 (!%p695_p5), %s711_s25, 3  ;;  %s176_s27 = scalar_lea.sflag (!%p695_p5), [#allocation4], %s711_s25 }
  0x33   : > { %s179_s15 = scalar_lea.vmem (!%p695_p5), [#allocation3], %s714_s26 }
  0x36   : > { %550 = dma.done.wait (%p650_p8), %s176_s27, 128  }
  0x37   : > { %552 = vsyncadd (%p650_p8), %s176_s27, 4294967168  ;;  %s185_s5 = scalar_lea.sflag [#allocation7], %s711_s25  ;;  %s188_s16 = scalar_lea.vmem [#allocation6], %s714_s26 }
  0x38   : > { %554 = dma.done.wait (%p650_p8), %s185_s5, 128  }
  0x39   : > { %556 = vsyncadd (%p650_p8), %s185_s5, 4294967168  ;;  %v219_v0 = vld [vmem:[%s179_s15] sm:$0xff]  ;;  %v220_v1 = vld [vmem:[%s188_s16] sm:$0xff]  ;;  %s213_s18 = scalar_lea.vmem [#allocation8], %s714_s26  ;;  %s371_s19 = sshll.u32 %s575_s12, 7 }
  0x3a   : > { %v221_v2 = vsub.f32 %v219_v0, %v220_v1  ;;  %s255_s21 = sshll.u32 %s213_s18, 4  ;;  %s253_s3 = scalar_lea.hbm %s777_s2, %s371_s19  ;;  %s730_s21 = int_to_ptr.vmem [resolvable:$true] %s255_s21 }
  0x3b   : > { %s242_s7 = scalar_lea.sflag [#allocation5], %s711_s25  ;;  %s499_s8 = scalar_lea.vmem %s730_s21, 128 }
  0x3c   : > { %v223_v3 = vmul.f32 %v221_v2, %v221_v2  ;;  %p500_p8 = scmp.ne.s32.totalorder %s730_s21, %s499_s8  ;;  %s587_s30 = smov [#allocation8]  }
  0x3d   : > { %s503_s12 = sshll.u32 %s587_s30, 4  ;;  %s504_s12 = int_to_ptr.vmem [resolvable:$false] %s503_s12 }
  0x3e   : > { %230 = vadd.xlane.f32.xlu0 %v223_v3  ;;  %p501_p0 = pnand %p500_p8, %p654_p9  ;;  %s505_s4 = scalar_lea.vmem %s504_s12, 256 }
  0x3f   : > { %p506_p13 = scmp.lt.s32.totalorder %s730_s21, %s504_s12  ;;  %p507_p5 = scmp.lt.s32.totalorder %s505_s4, %s499_s8 }
  0x40   : > { %p502_p3 = pneg %p501_p0 }
  0x41   : > { %p508_p12 = por %p507_p5, %p506_p13 }
  0x43   : > { %p509_p6 = pnand %p508_p12, %p502_p3 }
  0xc7   : > { %v231_v4 = vpop.xlane.xlu0 %230 }
  0xc8   : > { %v232_v5 = vrot.slane %v231_v4, 4 }
  0xca   : > { %v233_v6 = vadd.f32 %v232_v5, %v231_v4 }
  0xcc   : > { %v234_v7 = vrot.slane %v233_v6, 2 }
  0xce   : > { %v235_v8 = vadd.f32 %v234_v7, %v233_v6 }
  0xd0   : > { %v236_v9 = vrot.slane %v235_v8, 1 }
  0xd2   : > { %v237_v10 = vadd.f32 %v236_v9, %v235_v8 }
  0xd4   : > { %374 = vpush %v237_v10 }
 0x105   : > { %s375_s20 = spop %374 }
 0x106   : > { %v239_v11 = vstv %s375_s20 }
 0x107   : > { %240 = vst [vmem:[%s213_s18] sm:$0xff] %v239_v11 }
 0x108   : > { %512 = shalt.err (!%p509_p6)
}
 0x109   : > { %s513_s6 = scalar_lea.hbm %s253_s3, 128  ;;  %s517_s27 = scalar_lea.hbm %s777_s2, 256 }
 0x10a   : > { %p514_p7 = scmp.ne.s32.totalorder %s253_s3, %s513_s6  ;;  %p518_p4 = scmp.lt.s32.totalorder %s253_s3, %s777_s2 }
 0x10b   : > { %p519_p10 = scmp.lt.s32.totalorder %s517_s27, %s513_s6 }
 0x10c   : > { %p515_p1 = pnand %p514_p7, %p654_p9 }
 0x10d   : > { %p520_p8 = por %p519_p10, %p518_p4 }
 0x10e   : > { %p516_p2 = pneg %p515_p1 }
 0x110   : > { %p521_p0 = pnand %p520_p8, %p516_p2 }
 0x112   : > { %524 = shalt.err (!%p521_p0)
}
 0x113   : > { %380 = dma.vmem_to_hbm [thread:$0]  (%p654_p9), %s730_s21, 128, %s253_s3, %s242_s7  }
 0x114 PF: > { %s267_s16 = sand.u32 1, %s563_s9   ;;  %p784_p3 = scmp.ge.s32.totalorder %s583_s14, 2 }
 0x115   : > { %s268_s18 = scalar_lea.sflag [#allocation5], %s267_s16 }
 0x116   : > { %p390_p13 = pnand %p784_p3, %p661_p11 }
 0x118   : > { %p391_p5 = pneg %p390_p13 }
 0x11a   : > { %558 = dma.done.wait (%p391_p5), %s268_s18, 128  }
 0x11b   : > { %560 = vsyncadd (%p391_p5), %s268_s18, 4294967168  ;;  %s21_s14 = sadd.s32 1, %s583_s14   ;;  %s785_s9 = smov %s567_s10 }
 0x11c   : > { %p18_p12 = scmp.ge.s32.totalorder %s21_s14, 4   ;;  %s786_s10 = smov %s571_s11 }
 0x11d   : > { %s787_s11 = smov %s659_s23  ;;  %s788_s12 = smov %s579_s13 }
 0x11e   : > { %s789_s13 = smov %s791_s17  ;;  %20 = sbr.rel (!%p18_p12) target bundleno = 8 (0x8), region = 94 }
 0x123   :  { %273 = vsyncpa [#allocation4], 1 }
 0x124   :  { %275 = vsyncpa [#allocation4 + $0x1], 1 }
 0x125   :  { %276 = vsyncpa [#allocation7], 1 }
 0x126   :  { %278 = vsyncpa [#allocation7 + $0x1], 1 }
 0x127   :  { %279 = vsyncpa [#allocation5], 1 }
 0x128   :  { %281 = vsyncpa [#allocation5 + $0x1], 1 }

</bundles_post_ra>
